<compile_context>
chip_gen: v7x
topology: tpu7x:2x2x1
jax: 0.10.0
libtpu: 0.0.40
codegen_flags: <defaults>
</compile_context>

<pallas_src>
import functools
from typing import NamedTuple

import jax
import jax.numpy as jnp
from jax.experimental import pallas as pl
from jax.experimental.pallas import tpu as pltpu

LN_EPS = 1e-5  # nn.LayerNorm default


def _round_up(n, m):
    return (n + m - 1) // m * m


class PackedParams(NamedTuple):
    gamma: jax.Array   # (1, Hp) f32
    beta: jax.Array    # (1, Hp) f32
    w: jax.Array       # (Hp, Hp) bf16, laid out for x @ W
    b: jax.Array       # (1, Hp) f32
    h: int             # valid (unpadded) hidden size
    hp: int            # lane-padded hidden size (multiple of 128)


def pack_params(gamma, beta, w, b):
    """One-time (model-load) packing: pad the hidden axis to a lane-dense
    multiple of 128 and pre-cast the matmul weight to bf16, so no per-call
    HBM repack traffic."""
    H = int(w.shape[0])
    Hp = _round_up(max(H, 128), 128)
    if Hp == H:
        g2 = gamma.astype(jnp.float32).reshape(1, H)
        be2 = beta.astype(jnp.float32).reshape(1, H)
        b2 = b.astype(jnp.float32).reshape(1, H)
        w2 = w.astype(jnp.bfloat16)
    else:
        g2 = jnp.zeros((1, Hp), jnp.float32).at[0, :H].set(gamma.astype(jnp.float32))
        be2 = jnp.zeros((1, Hp), jnp.float32).at[0, :H].set(beta.astype(jnp.float32))
        b2 = jnp.zeros((1, Hp), jnp.float32).at[0, :H].set(b.astype(jnp.float32))
        w2 = jnp.zeros((Hp, Hp), jnp.bfloat16).at[:H, :H].set(w.astype(jnp.bfloat16))
    return PackedParams(g2, be2, w2, b2, H, Hp)


def residual_block_kernel(x_ref, gamma_ref, beta_ref, w_ref, b_ref, o_ref,
                          xn_ref, *, h_valid, mask_lanes):
    """One (row-tile, column-tile) step of the fused residual block.

    x_ref     : (TM, Hp)  input rows (also the residual); padded lanes are 0
    gamma_ref : (1, Hp)   LayerNorm weight  (padded lanes are 0)
    beta_ref  : (1, Hp)   LayerNorm bias    (padded lanes are 0)
    w_ref     : (Hp, TN)  bf16 weight column tile (x @ W layout, padded = 0)
    b_ref     : (1, TN)   Linear bias column tile (padded lanes are 0)
    o_ref     : (TM, TN)  output tile
    xn_ref    : (TM, Hp)  bf16 scratch caching LayerNorm(x) across column tiles
    """
    hp = x_ref.shape[-1]
    tn = o_ref.shape[-1]
    inv_h = jnp.float32(1.0 / h_valid)

    def layer_norm():
        x = x_ref[...].astype(jnp.float32)
        mean = jnp.sum(x, axis=-1, keepdims=True) * inv_h
        centered = x - mean
        if mask_lanes:
            lane_valid = jax.lax.broadcasted_iota(jnp.int32, (1, hp), 1) < h_valid
            centered = jnp.where(lane_valid, centered, 0.0)
        var = jnp.sum(centered * centered, axis=-1, keepdims=True) * inv_h
        # gamma/beta are zero on padded lanes, so xn is zero there as well.
        return (centered * jax.lax.rsqrt(var + LN_EPS)
                * gamma_ref[...].astype(jnp.float32)
                + beta_ref[...].astype(jnp.float32))

    bias = b_ref[...].astype(jnp.float32)

    if tn == hp:
        # Single column tile: whole weight resident, no scratch round-trip.
        xn = layer_norm()
        y = jnp.dot(xn.astype(jnp.bfloat16), w_ref[...],
                    preferred_element_type=jnp.float32)
        y = jnp.maximum(y + bias, 0.0)
        # StochasticDepth (mode='batch') is identity in eval.
        o_ref[...] = (y + x_ref[...].astype(jnp.float32)).astype(o_ref.dtype)
    else:
        j = pl.program_id(1)

        @pl.when(j == 0)
        def _():
            xn_ref[...] = layer_norm().astype(jnp.bfloat16)

        y = jnp.dot(xn_ref[...], w_ref[...], preferred_element_type=jnp.float32)
        y = jnp.maximum(y + bias, 0.0)
        col0 = pl.multiple_of(j * tn, 128)
        x_cols = x_ref[:, pl.ds(col0, tn)].astype(jnp.float32)
        o_ref[...] = (y + x_cols).astype(o_ref.dtype)


def residual_block(x, params: PackedParams, *, tile_rows=None, col_tile=None):
    """x: (B, L, H) -> (B, L, H), params from pack_params()."""
    B, L, H = x.shape
    assert H == params.h, "params were packed for a different hidden size"
    Hp = params.hp
    R = B * L

    # Row-tile target: bigger tiles amortize the ~0.35us per-grid-step cost in
    # the HBM-bound regime; keep it modest for larger hidden sizes so the
    # double-buffered x/out tiles stay well under v7x's 64 MiB VMEM.
    if tile_rows is None:
        if Hp <= 512:
            tile_rows = 1024
        elif Hp <= 1024:
            tile_rows = 512
        else:
            tile_rows = 256
    TM = min(tile_rows, _round_up(R, 8))

    # Column-tile the weight so the resident bf16 W tile stays <= ~8 MiB
    # (required for Hp >= ~2048 to fit v7x VMEM). LayerNorm is cached in
    # scratch and reused across column tiles.
    if col_tile is None:
        TN = Hp if (Hp * Hp * 2) <= (8 << 20) else 512
    else:
        TN = col_tile
    assert Hp % TN == 0 and TN % 128 == 0
    col_tiles = Hp // TN

    # Fast path: shapes already aligned -> no pad copy, no output slice.
    x2d = x.reshape(R, H)
    fast = (Hp == H) and (R % TM == 0)
    if fast:
        Rp = R
        x_in = x2d
    else:
        Rp = _round_up(R, TM)
        x_in = jnp.zeros((Rp, Hp), x.dtype).at[:R, :H].set(x2d)
    mask_lanes = (Hp != H)

    kernel = functools.partial(residual_block_kernel,
                               h_valid=H, mask_lanes=mask_lanes)

    # Constant-index operands: single-buffered (no pointless 2x VMEM).
    gamma_spec = pl.BlockSpec((1, Hp), lambda i, j: (0, 0),
                              pipeline_mode=pl.Buffered(1))
    beta_spec = pl.BlockSpec((1, Hp), lambda i, j: (0, 0),
                             pipeline_mode=pl.Buffered(1))
    if col_tiles == 1:
        w_spec = pl.BlockSpec((Hp, TN), lambda i, j: (0, j),
                              pipeline_mode=pl.Buffered(1))
        b_spec = pl.BlockSpec((1, TN), lambda i, j: (0, j),
                              pipeline_mode=pl.Buffered(1))
    else:
        w_spec = pl.BlockSpec((Hp, TN), lambda i, j: (0, j))
        b_spec = pl.BlockSpec((1, TN), lambda i, j: (0, j))

    # Generation-aware VMEM budget: actual tile footprint + margin
    # (instead of pinning the limit to the whole physical VMEM of a v7x TC).
    itemsize = x.dtype.itemsize
    needed = (2 * TM * Hp * itemsize                          # x tile (2 bufs)
              + 2 * TM * TN * itemsize                        # out tile (2 bufs)
              + (1 if col_tiles == 1 else 2) * Hp * TN * 2    # bf16 weight
              + TM * Hp * 2                                   # LN scratch (bf16)
              + 8 * Hp * 4)                                   # gamma/beta/bias
    vmem_limit = int(max(needed + (4 << 20), 16 << 20))

    out = pl.pallas_call(
        kernel,
        out_shape=jax.ShapeDtypeStruct((Rp, Hp), x.dtype),
        grid_spec=pltpu.PrefetchScalarGridSpec(
            num_scalar_prefetch=0,
            grid=(Rp // TM, col_tiles),
            in_specs=[
                pl.BlockSpec((TM, Hp), lambda i, j: (i, 0)),   # x rows
                gamma_spec,                                    # LN weight
                beta_spec,                                     # LN bias
                w_spec,                                        # W column tile
                b_spec,                                        # bias column tile
            ],
            out_specs=pl.BlockSpec((TM, TN), lambda i, j: (i, j)),
            scratch_shapes=[pltpu.VMEM((TM, Hp), jnp.bfloat16)],
        ),
        compiler_params=pltpu.CompilerParams(
            dimension_semantics=("parallel", "arbitrary"),
            vmem_limit_bytes=vmem_limit,
        ),
    )(x_in, params.gamma, params.beta, params.w, params.b)

    if fast:
        return out.reshape(B, L, H)
    return out[:R, :H].reshape(B, L, H)


def residual_block_ref(x, gamma, beta, w, b):
    """Pure-JAX f32 reference for correctness checking."""
    xf = x.astype(jnp.float32)
    mean = jnp.mean(xf, axis=-1, keepdims=True)
    var = jnp.mean((xf - mean) ** 2, axis=-1, keepdims=True)
    xn = (xf - mean) / jnp.sqrt(var + LN_EPS) * gamma + beta
    y = jnp.maximum(jnp.einsum("blh,hk->blk", xn, w) + b, 0.0)
    return (y + xf).astype(x.dtype)


if __name__ == "__main__":
    key = jax.random.PRNGKey(0)

    def make_case(case_key, B, L, H):
        k_x, k_g, k_b, k_w, k_bias = jax.random.split(case_key, 5)
        x = jax.random.normal(k_x, (B, L, H), dtype=jnp.float32)
        gamma = 1.0 + 0.01 * jax.random.normal(k_g, (H,), dtype=jnp.float32)
        beta = 0.01 * jax.random.normal(k_b, (H,), dtype=jnp.float32)
        w = jax.random.normal(k_w, (H, H), dtype=jnp.float32) / jnp.sqrt(H)
        bias = 0.01 * jax.random.normal(k_bias, (H,), dtype=jnp.float32)
        return x, gamma, beta, w, bias

    keys = jax.random.split(key, 3)

    # Case 1 (module spec shapes): batch=2, seq=8, hidden=32 -> ragged hidden,
    # exercises the pad path + lane-masked LayerNorm.
    x, g, be, w, bias = make_case(keys[0], 2, 8, 32)
    params = pack_params(g, be, w, bias)
    out = jax.block_until_ready(residual_block(x, params))
    ref = residual_block_ref(x, g, be, w, bias)
    assert out.shape == x.shape
    assert jnp.allclose(out, ref, atol=3e-2, rtol=3e-2), "case1 mismatch"

    # Case 2: hidden=128 -> aligned fast path (no pad copy, no lane mask).
    x, g, be, w, bias = make_case(keys[1], 2, 8, 128)
    params = pack_params(g, be, w, bias)
    out = jax.block_until_ready(residual_block(x, params))
    ref = residual_block_ref(x, g, be, w, bias)
    assert jnp.allclose(out, ref, atol=3e-2, rtol=3e-2), "case2 mismatch"

    # Case 3: small-scale stand-in for large hidden -> column-tiled weight grid
    # with the LayerNorm scratch reused across column tiles.
    x, g, be, w, bias = make_case(keys[2], 2, 8, 256)
    params = pack_params(g, be, w, bias)
    out = jax.block_until_ready(residual_block(x, params, col_tile=128))
    ref = residual_block_ref(x, g, be, w, bias)
    assert jnp.allclose(out, ref, atol=3e-2, rtol=3e-2), "case3 mismatch"

    print("KERNEL_OK")
</pallas_src>

<mosaic_0001>
module attributes {stable_mosaic.version = 11 : i64} {
  func.func @residual_block_kernel(%arg0: i32, %arg1: i32, %arg2: memref<16x128xf32, #tpu.memory_space<vmem>>, %arg3: memref<1x128xf32, #tpu.memory_space<vmem>>, %arg4: memref<1x128xf32, #tpu.memory_space<vmem>>, %arg5: memref<128x128xbf16, #tpu.memory_space<vmem>>, %arg6: memref<1x128xf32, #tpu.memory_space<vmem>>, %arg7: memref<16x128xf32, #tpu.memory_space<vmem>>, %arg8: memref<16x128xbf16, #tpu.memory_space<vmem>>) attributes {dimension_semantics = [#tpu.dimension_semantics<parallel>, #tpu.dimension_semantics<arbitrary>], iteration_bounds = array<i64: 1, 1>, scalar_prefetch = 0 : i64, scratch_operands = 1 : i64, tpu.core_type = #tpu.core_type<tc>, window_params = [{transform_indices = @transform_0, window_bounds = array<i64: 16, 128>}, {pipeline_mode = #tpu.pipeline_mode<synchronous>, transform_indices = @transform_1, window_bounds = array<i64: 1, 128>}, {pipeline_mode = #tpu.pipeline_mode<synchronous>, transform_indices = @transform_2, window_bounds = array<i64: 1, 128>}, {pipeline_mode = #tpu.pipeline_mode<synchronous>, transform_indices = @transform_3, window_bounds = array<i64: 128, 128>}, {pipeline_mode = #tpu.pipeline_mode<synchronous>, transform_indices = @transform_4, window_bounds = array<i64: 1, 128>}, {transform_indices = @transform_5, window_bounds = array<i64: 16, 128>}]} {
    %c0 = arith.constant 0 : index
    %c0_0 = arith.constant 0 : index
    %0 = vector.load %arg6[%c0, %c0_0] : memref<1x128xf32, #tpu.memory_space<vmem>>, vector<1x128xf32>
    %c0_1 = arith.constant 0 : index
    %c0_2 = arith.constant 0 : index
    %1 = vector.load %arg2[%c0_1, %c0_2] : memref<16x128xf32, #tpu.memory_space<vmem>>, vector<16x128xf32>
    %cst = arith.constant dense<0.000000e+00> : vector<16xf32>
    %2 = vector.multi_reduction <add>, %1, %cst [1] : vector<16x128xf32> to vector<16xf32>
    %3 = vector.shape_cast %2 : vector<16xf32> to vector<16x1xf32>
    %cst_3 = arith.constant 3.125000e-02 : f32
    %4 = vector.broadcast %cst_3 : f32 to vector<16x1xf32>
    %5 = arith.mulf %3, %4 : vector<16x1xf32>
    %6 = vector.broadcast %5 : vector<16x1xf32> to vector<16x128xf32>
    %7 = arith.subf %1, %6 : vector<16x128xf32>
    %8 = tpu.iota {dimensions = array<i32: 1>} : vector<1x128xi32>
    %c32_i32 = arith.constant 32 : i32
    %9 = vector.broadcast %c32_i32 : i32 to vector<1x128xi32>
    %10 = arith.cmpi slt, %8, %9 : vector<1x128xi32>
    %cst_4 = arith.constant 0.000000e+00 : f32
    %11 = vector.shape_cast %10 : vector<1x128xi1> to vector<1x128xi1>
    %12 = vector.broadcast %11 : vector<1x128xi1> to vector<16x128xi1>
    %13 = vector.broadcast %cst_4 : f32 to vector<16x128xf32>
    %14 = arith.select %12, %7, %13 : vector<16x128xi1>, vector<16x128xf32>
    %15 = arith.mulf %14, %14 : vector<16x128xf32>
    %cst_5 = arith.constant dense<0.000000e+00> : vector<16xf32>
    %16 = vector.multi_reduction <add>, %15, %cst_5 [1] : vector<16x128xf32> to vector<16xf32>
    %17 = vector.shape_cast %16 : vector<16xf32> to vector<16x1xf32>
    %cst_6 = arith.constant 3.125000e-02 : f32
    %18 = vector.broadcast %cst_6 : f32 to vector<16x1xf32>
    %19 = arith.mulf %17, %18 : vector<16x1xf32>
    %cst_7 = arith.constant 9.99999974E-6 : f32
    %20 = vector.broadcast %cst_7 : f32 to vector<16x1xf32>
    %21 = arith.addf %19, %20 : vector<16x1xf32>
    %22 = math.rsqrt %21 : vector<16x1xf32>
    %23 = vector.broadcast %22 : vector<16x1xf32> to vector<16x128xf32>
    %24 = arith.mulf %14, %23 : vector<16x128xf32>
    %c0_8 = arith.constant 0 : index
    %c0_9 = arith.constant 0 : index
    %25 = vector.load %arg3[%c0_8, %c0_9] : memref<1x128xf32, #tpu.memory_space<vmem>>, vector<1x128xf32>
    %26 = vector.broadcast %25 : vector<1x128xf32> to vector<16x128xf32>
    %27 = arith.mulf %24, %26 : vector<16x128xf32>
    %c0_10 = arith.constant 0 : index
    %c0_11 = arith.constant 0 : index
    %28 = vector.load %arg4[%c0_10, %c0_11] : memref<1x128xf32, #tpu.memory_space<vmem>>, vector<1x128xf32>
    %29 = vector.broadcast %28 : vector<1x128xf32> to vector<16x128xf32>
    %30 = arith.addf %27, %29 : vector<16x128xf32>
    %31 = arith.truncf %30 : vector<16x128xf32> to vector<16x128xbf16>
    %c0_12 = arith.constant 0 : index
    %c0_13 = arith.constant 0 : index
    %32 = vector.load %arg5[%c0_12, %c0_13] : memref<128x128xbf16, #tpu.memory_space<vmem>>, vector<128x128xbf16>
    %cst_14 = arith.constant dense<0.000000e+00> : vector<16x128xf32>
    %33 = tpu.matmul %31, %32, %cst_14 {dimension_numbers = #tpu.dot_dimension_numbers<[1], [0], [0], [1], [0, 0, 1, 1], [], []>} : vector<16x128xbf16>, vector<128x128xbf16>, vector<16x128xf32> -> vector<16x128xf32>
    %34 = vector.broadcast %0 : vector<1x128xf32> to vector<16x128xf32>
    %35 = arith.addf %33, %34 : vector<16x128xf32>
    %cst_15 = arith.constant 0.000000e+00 : f32
    %36 = vector.broadcast %cst_15 : f32 to vector<16x128xf32>
    %37 = arith.maximumf %35, %36 : vector<16x128xf32>
    %c0_16 = arith.constant 0 : index
    %c0_17 = arith.constant 0 : index
    %38 = vector.load %arg2[%c0_16, %c0_17] : memref<16x128xf32, #tpu.memory_space<vmem>>, vector<16x128xf32>
    %39 = arith.addf %37, %38 : vector<16x128xf32>
    %c0_18 = arith.constant 0 : index
    %c0_19 = arith.constant 0 : index
    %40 = vector.load %arg7[%c0_18, %c0_19] : memref<16x128xf32, #tpu.memory_space<vmem>>, vector<16x128xf32>
    tpu.vector_store %arg7[%c0_18, %c0_19], %39 {strides = array<i32>} : memref<16x128xf32, #tpu.memory_space<vmem>>, vector<16x128xf32>,
    return
  }
  func.func @transform_0(%arg0: i32, %arg1: i32) -> (i32, i32) {
    %c0_i32 = arith.constant 0 : i32
    %c0_i32_0 = arith.constant 0 : i32
    return %arg0, %c0_i32 : i32, i32
  }
  func.func @transform_1(%arg0: i32, %arg1: i32) -> (i32, i32) {
    %c0_i32 = arith.constant 0 : i32
    %c0_i32_0 = arith.constant 0 : i32
    %c0_i32_1 = arith.constant 0 : i32
    return %c0_i32, %c0_i32_0 : i32, i32
  }
  func.func @transform_2(%arg0: i32, %arg1: i32) -> (i32, i32) {
    %c0_i32 = arith.constant 0 : i32
    %c0_i32_0 = arith.constant 0 : i32
    %c0_i32_1 = arith.constant 0 : i32
    return %c0_i32, %c0_i32_0 : i32, i32
  }
  func.func @transform_3(%arg0: i32, %arg1: i32) -> (i32, i32) {
    %c0_i32 = arith.constant 0 : i32
    %c0_i32_0 = arith.constant 0 : i32
    return %c0_i32, %arg1 : i32, i32
  }
  func.func @transform_4(%arg0: i32, %arg1: i32) -> (i32, i32) {
    %c0_i32 = arith.constant 0 : i32
    %c0_i32_0 = arith.constant 0 : i32
    return %c0_i32, %arg1 : i32, i32
  }
  func.func @transform_5(%arg0: i32, %arg1: i32) -> (i32, i32) {
    %c0_i32 = arith.constant 0 : i32
    return %arg0, %arg1 : i32, i32
  }
}

</mosaic_0001>

<bundles_post_ra>
// kernel: tpu_custom_call.1
= control target key start
LH: loop header
LB: loop body
LE: loop exit
PB: predicated region body
PF: predicated region fallthrough
CT: control target
= control target key end

     0   :  { %10 = vsyncpa [#allocation4], 0  ;;  %s469_s0 = inlined_call_operand.hbm [shape: f32[16,128], index: 0, kind: input, shape index: {}]   ;;  %s470_s1 = inlined_call_operand.vmem [shape: f32[1,128], index: 1, kind: input, shape index: {}]   ;;  %s471_s2 = inlined_call_operand.vmem [shape: f32[1,128], index: 2, kind: input, shape index: {}]   ;;  %s472_s3 = inlined_call_operand.hbm [shape: bf16[128,128], index: 3, kind: input, shape index: {}]   ;;  %s473_s4 = inlined_call_operand.vmem [shape: f32[1,128], index: 4, kind: input, shape index: {}]   ;;  %s474_s5 = inlined_call_operand.hbm [shape: f32[16,128], index: 5, kind: output, shape index: {}]  }
   0x1   :  { %11 = vsyncpa [#allocation7], 0 }
   0x2   :  { %12 = vsyncpa [#allocation5], 0  ;;  %s369_s18 = smov [#allocation3]   ;;  %s297_s22 = scalar_lea.hbm %s469_s0, 256 }
   0x3   :  { %s18_s19 = sshll.u32 %s369_s18, 4  ;;  %p298_p0 = scmp.ne.s32.totalorder %s469_s0, %s297_s22  ;;  %s19_s19 = int_to_ptr.vmem [resolvable:$true] %s18_s19 }
   0x4   :  { %p301_p1 = scmp.lt.u32.totalorder %s297_s22, %s469_s0 }
   0x6   :  { %p303_p2 = pnand %p301_p1, %p298_p0 }
   0x8   :  { %306 = shalt.err (!%p303_p2)
}
   0x9   :  { %s307_s27 = scalar_lea.vmem %s19_s19, 256  ;;  %p312_p4 = scmp.lt.s32.totalorder %s19_s19, %s19_s19 }
   0xa   :  { %p308_p3 = scmp.ne.s32.totalorder %s19_s19, %s307_s27  ;;  %p313_p5 = scmp.lt.s32.totalorder %s307_s27, %s307_s27 }
   0xc   :  { %p314_p6 = por %p313_p5, %p312_p4 }
   0xe   :  { %p315_p7 = pnand %p314_p6, %p308_p3 }
  0x10   :  { %318 = shalt.err (!%p315_p7)
}
  0x11   :  { %s370_s28 = smov 128   ;;  %s371_s29 = smov 8  }
  0x12   :  { %24 = dma.hbm_to_vmem [thread:$0]  %s469_s0, 256, %s19_s19, [#allocation4], %s370_s28, %s370_s28, %s371_s29  }
  0x13   :  { %s372_s7 = smov [#allocation6]   ;;  %s319_s11 = scalar_lea.hbm %s472_s3, 1024 }
  0x14   :  { %s34_s8 = sshll.u32 %s372_s7, 4  ;;  %p320_p8 = scmp.ne.s32.totalorder %s472_s3, %s319_s11  ;;  %s35_s8 = int_to_ptr.vmem [resolvable:$true] %s34_s8 }
  0x15   :  { %p323_p9 = scmp.lt.u32.totalorder %s319_s11, %s472_s3 }
  0x17   :  { %p325_p10 = pnand %p323_p9, %p320_p8 }
  0x19   :  { %328 = shalt.err (!%p325_p10)
}
  0x1a   :  { %s329_s16 = scalar_lea.vmem %s35_s8, 1024  ;;  %p334_p12 = scmp.lt.s32.totalorder %s35_s8, %s35_s8 }
  0x1b   :  { %p330_p11 = scmp.ne.s32.totalorder %s35_s8, %s329_s16  ;;  %p335_p13 = scmp.lt.s32.totalorder %s329_s16, %s329_s16 }
  0x1d   :  { %p336_p0 = por %p335_p13, %p334_p12 }
  0x1f   :  { %p337_p1 = pnand %p336_p0, %p330_p11 }
  0x21   :  { %340 = shalt.err (!%p337_p1)
}
  0x22   :  { %s373_s0 = smov 64   ;;  %s374_s17 = smov 4  }
  0x23   :  { %40 = dma.hbm_to_vmem [thread:$0]  %s472_s3, 1024, %s35_s8, [#allocation7], %s373_s0, %s373_s0, %s374_s17  }
  0x24   :  { %363 = dma.done.wait [#allocation4], 256  }
  0x25   :  { %364 = vsyncadd [#allocation4], 4294967040 }
  0x26   :  { %365 = dma.done.wait [#allocation7], 1024  }
  0x27   :  { %366 = vsyncadd [#allocation7], 4294966272  ;;  %v435_v0 = vld [vmem:[#allocation3] sm:$0xff]  ;;  %v437_v1 = vld [vmem:[#allocation3 + $0x8] sm:$0xff]  ;;  %v375_v3 = vmov 0.0   ;;  %v61_v4 = vlaneseq  ;;  %vm376_vm1 = vmmov 0  }
  0x28   :  { %53 = vadd.xlane.f32.xlu0 %v435_v0  ;;  %v285_v2 = vld [vmem:[#allocation6] sm:$0xff]   ;;  %256 = vmatprep.subr.bf16.mxu0 %v375_v3  ;;  %v286_v16 = vld [vmem:[#allocation6 + $0x8] sm:$0xff]   ;;  %v287_v17 = vld [vmem:[#allocation6 + $0x10] sm:$0xff]  }
  0x29   :  { %257 = vmatpush3.bf16.msra.mxu0 %v285_v2  ;;  %v62_v5 = vand.u32 127, %v61_v4  ;;  %v288_v18 = vld [vmem:[#allocation6 + $0x18] sm:$0xff]   ;;  %v289_v19 = vld [vmem:[#allocation6 + $0x20] sm:$0xff]   ;;  %272 = vmatprep.mubr.msk.bf16.mxu0 %vm376_vm1, %v375_v3  ;;  %v290_v20 = vld [vmem:[#allocation6 + $0x28] sm:$0xff]  }
  0x2a   :  { %258 = vmatprep.subr.bf16.mxu0 %v375_v3  ;;  %v291_v21 = vld [vmem:[#allocation6 + $0x30] sm:$0xff]   ;;  %v292_v22 = vld [vmem:[#allocation6 + $0x38] sm:$0xff]  }
  0x2b   :  { %vm63_vm0 = vcmp.lt.s32.totalorder %v62_v5, 32  ;;  %v236_v31 = vld [vmem:[%s470_s1] ss:$0 sm:$0xff]  ;;  %s377_s1 = smov [#allocation8]  }
  0x2c   :  { %55 = vadd.xlane.f32.xlu0 %v437_v1  ;;  %v237_v35 = vld [vmem:[%s471_s2] ss:$0 sm:$0xff]  ;;  %s223_s25 = sshll.u32 %s377_s1, 4  ;;  %s224_s25 = int_to_ptr.vmem [resolvable:$true] %s223_s25 }
  0x2d   :  { %259 = vmatpush3.bf16.msra.mxu0 %v286_v16  ;;  %v238_v40 = vld [vmem:[%s473_s4] ss:$0 sm:$0xff]  ;;  %s341_s2 = scalar_lea.vmem %s224_s25, 256  ;;  %p346_p3 = scmp.lt.s32.totalorder %s224_s25, %s224_s25 }
  0x2e   :  { %260 = vmatprep.subr.bf16.mxu0 %v375_v3  ;;  %p342_p2 = scmp.ne.s32.totalorder %s224_s25, %s341_s2  ;;  %p347_p4 = scmp.lt.s32.totalorder %s341_s2, %s341_s2 }
  0x30   :  { %p348_p5 = por %p347_p4, %p346_p3 }
  0x31   :  { %261 = vmatpush3.bf16.msra.mxu0 %v287_v17 }
  0x32   :  { %262 = vmatprep.subr.bf16.mxu0 %v375_v3  ;;  %p349_p6 = pnand %p348_p5, %p342_p2 }
  0x35   :  { %263 = vmatpush3.bf16.msra.mxu0 %v288_v18 }
  0x36   :  { %264 = vmatprep.subr.bf16.mxu0 %v375_v3 }
  0x39   :  { %265 = vmatpush3.bf16.msra.mxu0 %v289_v19 }
  0x3a   :  { %266 = vmatprep.subr.bf16.mxu0 %v375_v3 }
  0x3d   :  { %267 = vmatpush3.bf16.msra.mxu0 %v290_v20 }
  0x3e   :  { %268 = vmatprep.subr.bf16.mxu0 %v375_v3 }
  0x41   :  { %269 = vmatpush3.bf16.msra.mxu0 %v291_v21 }
  0x42   :  { %270 = vmatprep.subr.bf16.mxu0 %v375_v3 }
  0x45   :  { %271 = vmatpush3.bf16.msra.mxu0 %v292_v22 }
  0xb5   :  { %v54_v6 = vpop.xlane.xlu0 %53 }
  0xb6   :  { %v57_v7 = vmul.f32 0.03125, %v54_v6 }
  0xb8   :  { %v59_v8 = vsub.f32 %v435_v0, %v57_v7 }
  0xb9   :  { %v56_v9 = vpop.xlane.xlu0 %55 }
  0xba   :  { %v58_v10 = vmul.f32 0.03125, %v56_v9  ;;  %v66_v11 = vsel %vm63_vm0, %v59_v8, 0.0 }
  0xbb   :  { %v68_v12 = vmul.f32 %v66_v11, %v66_v11 }
  0xbc   :  { %v60_v13 = vsub.f32 %v437_v1, %v58_v10 }
  0xbd   :  { %70 = vadd.xlane.f32.xlu1 %v68_v12 }
  0xbe   :  { %v67_v14 = vsel %vm63_vm0, %v60_v13, 0.0 }
  0xbf   :  { %v69_v15 = vmul.f32 %v67_v14, %v67_v14 }
  0xc1   :  { %72 = vadd.xlane.f32.xlu1 %v69_v15 }
 0x14a   :  { %v71_v23 = vpop.xlane.xlu1 %70 }
 0x14b   :  { %v74_v24 = vmul.f32 0.03125, %v71_v23 }
 0x14d   :  { %v76_v25 = vadd.f32 1e-05, %v74_v24 }
 0x14e   :  { %v73_v26 = vpop.xlane.xlu1 %72 }
 0x14f   :  { %293 = vrsqrt.f32 %v76_v25  ;;  %v75_v27 = vmul.f32 0.03125, %v73_v26 }
 0x151   :  { %v77_v28 = vadd.f32 1e-05, %v75_v27 }
 0x153   :  { %295 = vrsqrt.f32 %v77_v28 }
 0x159   :  { %v294_v29 = vpop.eup %293 }
 0x15a   :  { %v80_v30 = vmul.f32 %v294_v29, %v66_v11 }
 0x15c   :  { %v89_v34 = vmul.f32 %v236_v31, %v80_v30 }
 0x15d   :  { %v296_v32 = vpop.eup %295 }
 0x15e   :  { %v81_v33 = vmul.f32 %v296_v32, %v67_v14  ;;  %v98_v37 = vadd.f32 %v237_v35, %v89_v34 }
 0x160   :  { %v90_v36 = vmul.f32 %v236_v31, %v81_v33 }
 0x162   :  { %v99_v38 = vadd.f32 %v237_v35, %v90_v36 }
 0x164   :  { %v100_v39 = vpack.c.bf16 %v99_v38, %v98_v37 }
 0x166   :  { %273 = vmatmul.mubr.bf16.vlgmr.msra.gmra.mrb[0].mxu0 %v100_v39 }
 0x239   :  { %v205_v41 = vpop.f32.mrb[0].mxu0 }
 0x23a   :  { %v206_v42 = vadd.f32 %v238_v40, %v205_v41  ;;  %v274_v43 = vpop.f32.mrb[1].mxu0 }
 0x23b   :  { %v208_v44 = vpop.f32.mrb[2].mxu0 }
 0x23c   :  { %v212_v45 = vmax.f32 %v206_v42, 0.0  ;;  %v209_v46 = vadd.f32 %v238_v40, %v208_v44  ;;  %v275_v47 = vpop.f32.mrb[3].mxu0 }
 0x23e   :  { %v214_v48 = vadd.f32 %v212_v45, %v435_v0  ;;  %v213_v49 = vmax.f32 %v209_v46, 0.0 }
 0x240   :  { %216 = vst [vmem:[#allocation8] sm:$0xff] %v214_v48  ;;  %v215_v50 = vadd.f32 %v213_v49, %v437_v1 }
 0x242   :  { %217 = vst [vmem:[#allocation8 + $0x8] sm:$0xff] %v215_v50 }
 0x243   :  { %352 = shalt.err (!%p349_p6)
}
 0x244   :  { %s353_s27 = scalar_lea.hbm %s474_s5, 256 }
 0x245   :  { %p354_p7 = scmp.ne.s32.totalorder %s474_s5, %s353_s27  ;;  %p357_p8 = scmp.lt.u32.totalorder %s353_s27, %s474_s5 }
 0x247   :  { %p359_p9 = pnand %p357_p8, %p354_p7 }
 0x249   :  { %362 = shalt.err (!%p359_p9)
}
 0x24a   :  { %229 = dma.vmem_to_hbm [thread:$0]  %s224_s25, 256, %s474_s5, [#allocation5], %s370_s28, %s370_s28, %s371_s29  }
 0x24b   :  { %367 = dma.done.wait [#allocation5], 256  }
 0x24c   :  { %368 = vsyncadd [#allocation5], 4294967040 }
 0x24d   :  { %233 = vsyncpa [#allocation4], 1 }
 0x24e   :  { %234 = vsyncpa [#allocation7], 1 }
 0x24f   :  { %235 = vsyncpa [#allocation5], 1 }

</bundles_post_ra>
